<compile_context>
chip_gen: v7x
topology: tpu7x:2x2x1
jax: 0.10.0
libtpu: 0.0.40
codegen_flags: <defaults>
</compile_context>

<pallas_src>
import functools

import jax
import jax.numpy as jnp
from jax.experimental import pallas as pl
from jax.experimental.pallas import tpu as pltpu


# -----------------------------------------------------------------------------
# Fast path: identity resize == bandwidth-bound copy
# -----------------------------------------------------------------------------
def _copy_kernel(x_ref, o_ref):
    o_ref[...] = x_ref[...]


def _pallas_copy_2d(x2):
    """HBM-roofline copy of a 2D array using large, lane-friendly row tiles."""
    rows, cols = x2.shape
    itemsize = x2.dtype.itemsize

    # ~2 MiB per block; with in+out double buffering that's ~8 MiB of VMEM,
    # comfortably inside the scoped limit on v5e / v6e / v7x.
    target_block_bytes = 2 * 1024 * 1024
    max_rows = max(1, target_block_bytes // (cols * itemsize))
    if rows <= max_rows:
        tr = rows                                  # full extent -> always legal
    else:
        tr = max(8, (max_rows // 8) * 8)           # multiple of 8 sublanes

    grid = (pl.cdiv(rows, tr),)

    return pl.pallas_call(
        _copy_kernel,
        out_shape=jax.ShapeDtypeStruct((rows, cols), x2.dtype),
        grid_spec=pltpu.PrefetchScalarGridSpec(
            num_scalar_prefetch=0,
            grid=grid,
            in_specs=[pl.BlockSpec((tr, cols), lambda i: (i, 0))],
            out_specs=pl.BlockSpec((tr, cols), lambda i: (i, 0)),
        ),
        compiler_params=pltpu.CompilerParams(
            dimension_semantics=("parallel",),
            vmem_limit_bytes=32 * 1024 * 1024,
        ),
        cost_estimate=pl.CostEstimate(
            flops=0,
            transcendentals=0,
            bytes_accessed=2 * rows * cols * itemsize,
        ),
    )(x2)


# -----------------------------------------------------------------------------
# General path: nearest-neighbor resize via hoisted one-hot selection matrices
# -----------------------------------------------------------------------------
def _resize_kernel(x_ref, r_ref, ct_ref, o_ref):
    """One (H_in, W_in) plane -> (H_out, W_out) via out = R @ x @ C^T.

    R and C^T are built once in the wrapper (not per grid step) and stay
    VMEM-resident across the grid (constant index_map).  One-hot selection is
    exact: every output element accumulates exactly one input value in f32.
    """
    x = x_ref[...].astype(jnp.float32)                                  # (Hi, Wi)
    y = jnp.dot(r_ref[...], x, preferred_element_type=jnp.float32)      # (Ho, Wi)
    y = jnp.dot(y, ct_ref[...], preferred_element_type=jnp.float32)     # (Ho, Wo)
    o_ref[...] = y.astype(o_ref.dtype)


def _nearest_resize_pallas(x_flat, h_out, w_out):
    """x_flat: (planes, H_in, W_in) -> (planes, H_out, W_out), nearest mode."""
    planes, h_in, w_in = x_flat.shape

    # PyTorch F.interpolate(mode='nearest') index rule: src = floor(dst*in/out).
    row_src = (jnp.arange(h_out, dtype=jnp.int32) * h_in) // h_out
    col_src = (jnp.arange(w_out, dtype=jnp.int32) * w_in) // w_out
    R = (row_src[:, None] == jnp.arange(h_in, dtype=jnp.int32)[None, :])
    R = R.astype(jnp.float32)                                           # (Ho, Hi)
    Ct = (jnp.arange(w_in, dtype=jnp.int32)[:, None] == col_src[None, :])
    Ct = Ct.astype(jnp.float32)                                         # (Wi, Wo)

    flops = 2 * planes * (h_out * h_in * w_in + h_out * w_in * w_out)
    bytes_accessed = (x_flat.size + planes * h_out * w_out) * x_flat.dtype.itemsize

    return pl.pallas_call(
        _resize_kernel,
        out_shape=jax.ShapeDtypeStruct((planes, h_out, w_out), x_flat.dtype),
        grid_spec=pltpu.PrefetchScalarGridSpec(
            num_scalar_prefetch=0,
            grid=(planes,),
            in_specs=[
                # One plane per step, leading dim squeezed away.
                pl.BlockSpec((None, h_in, w_in), lambda n: (n, 0, 0)),
                # R and C^T: same block every step -> fetched once, stays in VMEM.
                pl.BlockSpec((h_out, h_in), lambda n: (0, 0)),
                pl.BlockSpec((w_in, w_out), lambda n: (0, 0)),
            ],
            out_specs=pl.BlockSpec((None, h_out, w_out), lambda n: (n, 0, 0)),
        ),
        compiler_params=pltpu.CompilerParams(
            dimension_semantics=("parallel",),
            vmem_limit_bytes=32 * 1024 * 1024,
        ),
        cost_estimate=pl.CostEstimate(
            flops=flops,
            transcendentals=0,
            bytes_accessed=bytes_accessed,
        ),
    )(x_flat, R, Ct)


# -----------------------------------------------------------------------------
# Net.forward equivalent
# -----------------------------------------------------------------------------
@functools.partial(jax.jit, static_argnames=("out_size",))
def net_forward(x, out_size=None):
    """Pallas equivalent of Net.forward. x is NCHW; returns NCHW."""
    b, c, h, w = x.shape
    if out_size is None:
        out_size = (h, w)  # exactly what the module does: F.interpolate(x, size=(h, w))
    h_out, w_out = out_size

    if (h_out, w_out) == (h, w):
        # Identity fast path: nearest resize to the same size is a pure copy.
        # Present a lane-dense 2D view so stores are full-width unmasked vst.
        total = x.size
        if total % 128 == 0:
            x2 = x.reshape(total // 128, 128)
        else:
            x2 = x.reshape(b * c * h, w)
        y2 = _pallas_copy_2d(x2)
        return y2.reshape(b, c, h, w)

    # General nearest-neighbor resize.
    x_flat = x.reshape(b * c, h, w)
    out_flat = _nearest_resize_pallas(x_flat, h_out, w_out)
    return out_flat.reshape(b, c, h_out, w_out)


def _nearest_ref(x, h_out, w_out):
    """Pure-JAX reference using the same floor(dst*in/out) rule as PyTorch."""
    b, c, h, w = x.shape
    ri = (jnp.arange(h_out) * h) // h_out
    ci = (jnp.arange(w_out) * w) // w_out
    return x[:, :, ri, :][:, :, :, ci]


if __name__ == "__main__":
    key = jax.random.PRNGKey(0)
    B, C, H, W = 2, 4, 16, 16
    x = jax.random.normal(key, (B, C, H, W), dtype=jnp.float32)

    # Module semantics as written: resize to its own size (identity values).
    y = net_forward(x)
    y = jax.block_until_ready(y)
    assert y.shape == (B, C, H, W)
    assert jnp.array_equal(y, x), "nearest resize to same size must equal input"

    # Exercise the general (non-identity) resize path as well.
    y_up = net_forward(x, out_size=(24, 40))
    y_up = jax.block_until_ready(y_up)
    y_up_ref = _nearest_ref(x, 24, 40)
    assert y_up.shape == (B, C, 24, 40)
    assert jnp.allclose(y_up, y_up_ref, atol=1e-6), "nearest resize mismatch"

    print("KERNEL_OK")
</pallas_src>

<mosaic_0001>
module attributes {stable_mosaic.version = 11 : i64} {
  func.func @_copy_kernel(%arg0: i32, %arg1: memref<16x128xf32, #tpu.memory_space<vmem>>, %arg2: memref<16x128xf32, #tpu.memory_space<vmem>>) attributes {dimension_semantics = [#tpu.dimension_semantics<parallel>], iteration_bounds = array<i64: 1>, scalar_prefetch = 0 : i64, scratch_operands = 0 : i64, tpu.core_type = #tpu.core_type<tc>, window_params = [{transform_indices = @transform_0, window_bounds = array<i64: 16, 128>}, {transform_indices = @transform_1, window_bounds = array<i64: 16, 128>}]} {
    %c0 = arith.constant 0 : index
    %c0_0 = arith.constant 0 : index
    %0 = vector.load %arg1[%c0, %c0_0] : memref<16x128xf32, #tpu.memory_space<vmem>>, vector<16x128xf32>
    %c0_1 = arith.constant 0 : index
    %c0_2 = arith.constant 0 : index
    %1 = vector.load %arg2[%c0_1, %c0_2] : memref<16x128xf32, #tpu.memory_space<vmem>>, vector<16x128xf32>
    tpu.vector_store %arg2[%c0_1, %c0_2], %0 {strides = array<i32>} : memref<16x128xf32, #tpu.memory_space<vmem>>, vector<16x128xf32>,
    return
  }
  func.func @transform_0(%arg0: i32) -> (i32, i32) {
    %c0_i32 = arith.constant 0 : i32
    %c0_i32_0 = arith.constant 0 : i32
    return %arg0, %c0_i32 : i32, i32
  }
  func.func @transform_1(%arg0: i32) -> (i32, i32) {
    %c0_i32 = arith.constant 0 : i32
    %c0_i32_0 = arith.constant 0 : i32
    return %arg0, %c0_i32 : i32, i32
  }
}

</mosaic_0001>

<bundles_post_ra>
// kernel: net_forward.1
= control target key start
LH: loop header
LB: loop body
LE: loop exit
PB: predicated region body
PF: predicated region fallthrough
CT: control target
= control target key end

     0   :  { %s38_s0 = inlined_call_operand.vmem [shape: f32[16,128], index: 0, kind: input, shape index: {}]   ;;  %s39_s1 = inlined_call_operand.vmem [shape: f32[16,128], index: 1, kind: output, shape index: {}]  }
   0x1   :  { %v8_v0 = vld [vmem:[%s38_s0] sm:$0xff]  ;;  %v9_v1 = vld [vmem:[%s38_s0 + $0x8] sm:$0xff] }
   0x2   :  { %10 = vst [vmem:[%s39_s1] sm:$0xff] %v8_v0  ;;  %11 = vst [vmem:[%s39_s1 + $0x8] sm:$0xff] %v9_v1 }

</bundles_post_ra>
